<compile_context>
chip_gen: v7x
topology: tpu7x:2x2x1
jax: 0.10.0
libtpu: 0.0.40
codegen_flags: <defaults>
</compile_context>

<pallas_src>
import functools

import jax
import jax.numpy as jnp
from jax.experimental import pallas as pl
from jax.experimental.pallas import tpu as pltpu


LANE = 128     # TPU lane width
S_CAP = 512    # max sublane rows per spatial tile (512 * 128 = 65536 px / tile)
S_MIN = 32


def _round_up(a, m):
    return ((a + m - 1) // m) * m


def _sublane_mult(dtype):
    # minimum non-full-extent sublane tile for a dtype: f32 -> 8, bf16 -> 16, int8 -> 32
    return max(8, 32 // jnp.dtype(dtype).itemsize)


def _fold_rows(a):
    """(S, 128) -> (8, 128) partial sums via pure VPU vreg adds (requires S % 8 == 0)."""
    s = a.shape[0]
    if s == 8:
        return a
    return jnp.sum(a.reshape(s // 8, 8, LANE), axis=0)


def _loss_kernel(x_ref, t_ref, acc_ref, *, n_cls, gamma, eps, has_pad):
    t_idx = pl.program_id(1)

    # Zero the per-batch resident accumulator block at the start of the reduction axis.
    @pl.when(t_idx == 0)
    def _init():
        acc_ref[...] = jnp.zeros_like(acc_ref)

    x = x_ref[0].astype(jnp.float32)        # (C, S, 128) logits
    lbl = t_ref[0, 0].astype(jnp.int32)     # (S, 128) labels (padded pixels -> n_cls)

    # Softmax over the class axis.  Leading-axis max/sum are elementwise vreg ops (VPU);
    # the divide is one EUP approx reciprocal + a single Newton-Raphson step.
    m = jnp.max(x, axis=0, keepdims=True)   # (1, S, 128)
    e = jnp.exp(x - m)                      # (C, S, 128)  (EUP)
    denom = jnp.sum(e, axis=0)              # (S, 128)
    r0 = pl.reciprocal(denom, approx=True)
    inv = r0 * (2.0 - denom * r0)           # ~f32-accurate 1/denom

    if has_pad:
        # Padded pixels carry the out-of-range label n_cls.
        valid = (lbl < n_cls).astype(jnp.float32)   # (S, 128)

    # Per-class masks instead of a materialized one-hot; accumulate lane/sublane partials
    # (pure VPU adds) into the resident (3C+1, 8, 128) output block.
    pt = None
    for c in range(n_cls):
        mask_c = (lbl == c).astype(jnp.float32)             # (S, 128)
        p_c = e[c] * inv                                     # (S, 128) softmax prob of class c
        tp_c = p_c * mask_c
        pt = tp_c if pt is None else pt + tp_c
        acc_ref[0, c] += _fold_rows(tp_c)                    # sum(p * onehot)   -> tp
        acc_ref[0, n_cls + c] += _fold_rows(p_c * valid if has_pad else p_c)   # sum(p)
        acc_ref[0, 2 * n_cls + c] += _fold_rows(mask_c)      # sum(onehot)

    # Focal term: -(1 - p_t)^gamma * log(p_t + eps)
    one_minus = 1.0 - pt
    if gamma == 2.0:
        w = one_minus * one_minus            # gamma==2 fast path (pure VPU)
    else:
        w = jnp.power(jnp.maximum(one_minus, 0.0), gamma)
    focal_pix = -w * jnp.log(pt + eps)
    if has_pad:
        focal_pix = focal_pix * valid
    acc_ref[0, 3 * n_cls] += _fold_rows(focal_pix)


def _vmem_plan(C, x_dtype, t_dtype):
    """Pick the max sublane rows per tile from the generation's VMEM capacity."""
    try:
        vmem_phys = int(pltpu.get_tpu_info().vmem_capacity_bytes)
    except Exception:
        vmem_phys = 64 * 1024 * 1024         # conservative (v7x physical size)
    vmem_limit = min((vmem_phys * 3) // 4, 100 * 1024 * 1024)
    budget = vmem_limit // 2                 # headroom for pipeline + compiler temps
    xb = jnp.dtype(x_dtype).itemsize
    tb = jnp.dtype(t_dtype).itemsize
    # bytes per sublane row across the pipeline:
    #   2x double-buffered logits + 2x labels + ~4 live (C,*,128) f32 temps + (S,128) slabs
    per_row = LANE * (2 * C * xb + 2 * tb + 4 * C * 4 + 8 * 4)
    s_max = max(S_MIN, min(S_CAP, budget // per_row))
    s_max = (s_max // 32) * 32
    return s_max, int(vmem_limit)


def _tile_plan(HW, s_max, row_mult):
    """Return (s_block, r_pad): s_block divides r_pad, r_pad * LANE >= HW."""
    R = pl.cdiv(HW, LANE)
    if R <= s_max:
        s_block = _round_up(max(R, row_mult), row_mult)
        return s_block, s_block
    if HW % LANE == 0:
        # Try to find a tile height that divides the extent exactly -> no wrapper pad copy.
        d = s_max
        while d >= max(64, row_mult):
            if R % d == 0:
                return d, R
            d -= row_mult
    s_block = s_max
    return s_block, _round_up(R, s_block)


def dc_and_focaltversky_loss(net_output, target, *,
                             weight_dice=1.0, weight_focal=1.0,
                             smooth=1e-5, do_bg=False, gamma=2.0, eps=1e-8):
    """net_output: (B, C, H, W) float logits; target: (B, 1, H, W) int labels."""
    B, C, H, W = net_output.shape
    assert target.shape == (B, 1, H, W)
    HW = H * W

    t_dtype = jnp.int8 if C <= 127 else jnp.int32
    s_max, vmem_limit = _vmem_plan(C, net_output.dtype, t_dtype)
    row_mult = max(_sublane_mult(net_output.dtype), _sublane_mult(t_dtype))
    s_block, r_pad = _tile_plan(HW, s_max, row_mult)
    HWp = r_pad * LANE
    has_pad = HWp != HW

    x = net_output.reshape(B, C, HW)                       # dtype preserved; cast in-kernel
    tgt = target.reshape(B, 1, HW).astype(t_dtype)
    if has_pad:
        x = jnp.pad(x, ((0, 0), (0, 0), (0, HWp - HW)))
        # Pad labels with the out-of-range class C so masks / valid-pixel mask vanish there.
        tgt = jnp.pad(tgt, ((0, 0), (0, 0), (0, HWp - HW)), constant_values=C)
    x = x.reshape(B, C, r_pad, LANE)
    tgt = tgt.reshape(B, 1, r_pad, LANE)

    n_acc = 3 * C + 1
    grid = (B, r_pad // s_block)
    kernel = functools.partial(_loss_kernel, n_cls=C, gamma=float(gamma),
                               eps=float(eps), has_pad=has_pad)

    acc = pl.pallas_call(
        kernel,
        out_shape=jax.ShapeDtypeStruct((B, n_acc, 8, LANE), jnp.float32),
        grid_spec=pltpu.PrefetchScalarGridSpec(
            num_scalar_prefetch=0,
            grid=grid,
            in_specs=[
                pl.BlockSpec((1, C, s_block, LANE), lambda b, t: (b, 0, t, 0)),
                pl.BlockSpec((1, 1, s_block, LANE), lambda b, t: (b, 0, t, 0)),
            ],
            out_specs=pl.BlockSpec((1, n_acc, 8, LANE), lambda b, t: (b, 0, 0, 0)),
        ),
        compiler_params=pltpu.CompilerParams(
            dimension_semantics=("parallel", "arbitrary"),
            vmem_limit_bytes=vmem_limit),
    )(x, tgt)

    # --- tiny final reductions (glue, plain JAX) ---------------------------
    sums = jnp.sum(acc, axis=(2, 3))                 # (B, 3C+1)
    tp = sums[:, 0:C]
    p_sum = sums[:, C:2 * C]
    oh_sum = sums[:, 2 * C:3 * C]
    foc = sums[:, 3 * C]

    fp = p_sum - tp                                  # sum(p*(1-oh)) = sum(p) - tp
    fn = oh_sum - tp                                 # sum((1-p)*oh) = sum(oh) - tp

    # SoftDiceLoss (batch_dice=False): per-(b, c) dice then mean over fg classes.
    nominator = 2.0 * tp + smooth
    denominator = jnp.clip(2.0 * tp + fp + fn + smooth, 1e-8, None)
    dc = nominator / denominator                     # (B, C)
    if not do_bg:
        dc = dc[:, 1:]
    dc_loss = -jnp.mean(dc)

    # FocalLoss: mean over all pixels (alpha = 1).
    focal_loss = jnp.sum(foc) / float(B * HW)

    return weight_focal * focal_loss + weight_dice * dc_loss


def _reference(net_output, target, *, smooth=1e-5, do_bg=False, gamma=2.0, eps=1e-8):
    """Pure-JAX reference for a correctness sanity check."""
    B, C, H, W = net_output.shape
    p = jax.nn.softmax(net_output.astype(jnp.float32), axis=1)     # (B,C,H,W)
    lbl = target[:, 0].astype(jnp.int32)                           # (B,H,W)
    oh = jax.nn.one_hot(lbl, C, axis=1, dtype=jnp.float32)         # (B,C,H,W)
    axes = (2, 3)
    tp = jnp.sum(p * oh, axis=axes)
    fp = jnp.sum(p * (1 - oh), axis=axes)
    fn = jnp.sum((1 - p) * oh, axis=axes)
    dc = (2 * tp + smooth) / jnp.clip(2 * tp + fp + fn + smooth, 1e-8, None)
    if not do_bg:
        dc = dc[:, 1:]
    dc_loss = -jnp.mean(dc)
    pt = jnp.sum(p * oh, axis=1)                                   # (B,H,W)
    focal = jnp.mean(-((1 - pt) ** gamma) * jnp.log(pt + eps))
    return focal + dc_loss


if __name__ == "__main__":
    key = jax.random.PRNGKey(0)
    keys = jax.random.split(key, 8)

    def run_case(kx, kt, B, C, H, W):
        x = jax.random.normal(kx, (B, C, H, W), dtype=jnp.float32)
        t = jax.random.randint(kt, (B, 1, H, W), 0, C, dtype=jnp.int32)
        out = jax.block_until_ready(dc_and_focaltversky_loss(x, t))
        ref = _reference(x, t)
        assert jnp.allclose(out, ref, rtol=1e-4, atol=1e-5), (out, ref)

    # Case 1: small, 128-aligned spatial extent (single tile).
    run_case(keys[0], keys[1], 2, 4, 16, 16)
    # Case 2: ragged spatial extent (element padding + valid-pixel masking).
    run_case(keys[2], keys[3], 2, 4, 10, 13)
    # Case 3: multi-tile, lane-aligned; tile height divides the extent (no pad copy).
    run_case(keys[4], keys[5], 2, 4, 320, 320)
    # Case 4: multi-tile with wrapper padding (lane-unaligned large extent, B=1, C=5).
    run_case(keys[6], keys[7], 1, 5, 300, 300)

    print("KERNEL_OK")
</pallas_src>

<mosaic_0001>
module attributes {stable_mosaic.version = 11 : i64} {
  func.func @_loss_kernel(%arg0: i32, %arg1: i32, %arg2: memref<1x4x32x128xf32, #tpu.memory_space<vmem>>, %arg3: memref<1x1x32x128xi8, #tpu.memory_space<vmem>>, %arg4: memref<1x13x8x128xf32, #tpu.memory_space<vmem>>) attributes {dimension_semantics = [#tpu.dimension_semantics<parallel>, #tpu.dimension_semantics<arbitrary>], iteration_bounds = array<i64: 2, 1>, scalar_prefetch = 0 : i64, scratch_operands = 0 : i64, tpu.core_type = #tpu.core_type<tc>, window_params = [{transform_indices = @transform_0, window_bounds = array<i64: 1, 4, 32, 128>}, {transform_indices = @transform_1, window_bounds = array<i64: 1, 1, 32, 128>}, {transform_indices = @transform_2, window_bounds = array<i64: 1, 13, 8, 128>}]} {
    %c0_i32 = arith.constant 0 : i32
    %0 = arith.cmpi eq, %arg1, %c0_i32 : i32
    %1 = arith.extui %0 : i1 to i32
    %c0_i32_0 = arith.constant 0 : i32
    %2 = arith.cmpi ne, %1, %c0_i32_0 : i32
    scf.if %2 {
      %cst_119 = arith.constant 0.000000e+00 : f32
      %176 = vector.broadcast %cst_119 : f32 to vector<1x13x8x128xf32>
      %c0_120 = arith.constant 0 : index
      %c0_121 = arith.constant 0 : index
      %c0_122 = arith.constant 0 : index
      %c0_123 = arith.constant 0 : index
      %177 = vector.load %arg4[%c0_120, %c0_121, %c0_122, %c0_123] : memref<1x13x8x128xf32, #tpu.memory_space<vmem>>, vector<1x13x8x128xf32>
      tpu.vector_store %arg4[%c0_120, %c0_121, %c0_122, %c0_123], %176 {strides = array<i32>} : memref<1x13x8x128xf32, #tpu.memory_space<vmem>>, vector<1x13x8x128xf32>,
    } else {
    }
    %c0 = arith.constant 0 : index
    %c0_1 = arith.constant 0 : index
    %c0_2 = arith.constant 0 : index
    %c0_3 = arith.constant 0 : index
    %3 = vector.load %arg2[%c0, %c0_1, %c0_2, %c0_3] : memref<1x4x32x128xf32, #tpu.memory_space<vmem>>, vector<1x4x32x128xf32>
    %4 = vector.shape_cast %3 : vector<1x4x32x128xf32> to vector<4x32x128xf32>
    %c0_4 = arith.constant 0 : index
    %c0_5 = arith.constant 0 : index
    %c0_6 = arith.constant 0 : index
    %c0_7 = arith.constant 0 : index
    %5 = vector.load %arg3[%c0_4, %c0_5, %c0_6, %c0_7] : memref<1x1x32x128xi8, #tpu.memory_space<vmem>>, vector<1x1x32x128xi8>
    %6 = vector.shape_cast %5 : vector<1x1x32x128xi8> to vector<32x128xi8>
    %7 = arith.extsi %6 : vector<32x128xi8> to vector<32x128xi32>
    %cst = arith.constant dense<0xFF800000> : vector<32x128xf32>
    %8 = vector.multi_reduction <maximumf>, %4, %cst [0] : vector<4x32x128xf32> to vector<32x128xf32>
    %9 = vector.shape_cast %8 : vector<32x128xf32> to vector<1x32x128xf32>
    %10 = vector.broadcast %9 : vector<1x32x128xf32> to vector<4x32x128xf32>
    %11 = arith.subf %4, %10 : vector<4x32x128xf32>
    %12 = math.exp %11 : vector<4x32x128xf32>
    %cst_8 = arith.constant dense<0.000000e+00> : vector<32x128xf32>
    %13 = vector.multi_reduction <add>, %12, %cst_8 [0] : vector<4x32x128xf32> to vector<32x128xf32>
    %14 = tpu.reciprocal %13 {approx = true} : vector<32x128xf32> -> vector<32x128xf32>
    %15 = arith.mulf %13, %14 : vector<32x128xf32>
    %cst_9 = arith.constant 2.000000e+00 : f32
    %16 = vector.broadcast %cst_9 : f32 to vector<32x128xf32>
    %17 = arith.subf %16, %15 : vector<32x128xf32>
    %18 = arith.mulf %14, %17 : vector<32x128xf32>
    %c4_i32 = arith.constant 4 : i32
    %19 = vector.broadcast %c4_i32 : i32 to vector<32x128xi32>
    %20 = arith.cmpi slt, %7, %19 : vector<32x128xi32>
    %21 = arith.extui %20 : vector<32x128xi1> to vector<32x128xi32>
    %22 = arith.sitofp %21 : vector<32x128xi32> to vector<32x128xf32>
    %c0_i32_10 = arith.constant 0 : i32
    %23 = vector.broadcast %c0_i32_10 : i32 to vector<32x128xi32>
    %24 = arith.cmpi eq, %7, %23 : vector<32x128xi32>
    %25 = arith.extui %24 : vector<32x128xi1> to vector<32x128xi32>
    %26 = arith.sitofp %25 : vector<32x128xi32> to vector<32x128xf32>
    %27 = vector.extract_strided_slice %12 {offsets = [0, 0, 0], sizes = [1, 32, 128], strides = [1, 1, 1]} : vector<4x32x128xf32> to vector<1x32x128xf32>
    %28 = vector.shape_cast %27 : vector<1x32x128xf32> to vector<32x128xf32>
    %29 = arith.mulf %28, %18 : vector<32x128xf32>
    %30 = arith.mulf %29, %26 : vector<32x128xf32>
    %c0_11 = arith.constant 0 : index
    %c0_12 = arith.constant 0 : index
    %c0_13 = arith.constant 0 : index
    %c0_14 = arith.constant 0 : index
    %31 = vector.load %arg4[%c0_11, %c0_12, %c0_13, %c0_14] : memref<1x13x8x128xf32, #tpu.memory_space<vmem>>, vector<1x1x8x128xf32>
    %32 = vector.shape_cast %31 : vector<1x1x8x128xf32> to vector<8x128xf32>
    %33 = vector.shape_cast %30 : vector<32x128xf32> to vector<4x8x128xf32>
    %cst_15 = arith.constant dense<0.000000e+00> : vector<8x128xf32>
    %34 = vector.multi_reduction <add>, %33, %cst_15 [0] : vector<4x8x128xf32> to vector<8x128xf32>
    %35 = arith.addf %32, %34 : vector<8x128xf32>
    %c0_16 = arith.constant 0 : index
    %c0_17 = arith.constant 0 : index
    %c0_18 = arith.constant 0 : index
    %c0_19 = arith.constant 0 : index
    %36 = vector.load %arg4[%c0_16, %c0_17, %c0_18, %c0_19] : memref<1x13x8x128xf32, #tpu.memory_space<vmem>>, vector<1x1x8x128xf32>
    %37 = vector.shape_cast %36 : vector<1x1x8x128xf32> to vector<8x128xf32>
    %38 = vector.shape_cast %35 : vector<8x128xf32> to vector<1x1x8x128xf32>
    tpu.vector_store %arg4[%c0_16, %c0_17, %c0_18, %c0_19], %38 {strides = array<i32>} : memref<1x13x8x128xf32, #tpu.memory_space<vmem>>, vector<1x1x8x128xf32>,
    %c0_20 = arith.constant 0 : index
    %c4 = arith.constant 4 : index
    %c0_21 = arith.constant 0 : index
    %c0_22 = arith.constant 0 : index
    %39 = vector.load %arg4[%c0_20, %c4, %c0_21, %c0_22] : memref<1x13x8x128xf32, #tpu.memory_space<vmem>>, vector<1x1x8x128xf32>
    %40 = vector.shape_cast %39 : vector<1x1x8x128xf32> to vector<8x128xf32>
    %41 = arith.mulf %29, %22 : vector<32x128xf32>
    %42 = vector.shape_cast %41 : vector<32x128xf32> to vector<4x8x128xf32>
    %cst_23 = arith.constant dense<0.000000e+00> : vector<8x128xf32>
    %43 = vector.multi_reduction <add>, %42, %cst_23 [0] : vector<4x8x128xf32> to vector<8x128xf32>
    %44 = arith.addf %40, %43 : vector<8x128xf32>
    %c0_24 = arith.constant 0 : index
    %c4_25 = arith.constant 4 : index
    %c0_26 = arith.constant 0 : index
    %c0_27 = arith.constant 0 : index
    %45 = vector.load %arg4[%c0_24, %c4_25, %c0_26, %c0_27] : memref<1x13x8x128xf32, #tpu.memory_space<vmem>>, vector<1x1x8x128xf32>
    %46 = vector.shape_cast %45 : vector<1x1x8x128xf32> to vector<8x128xf32>
    %47 = vector.shape_cast %44 : vector<8x128xf32> to vector<1x1x8x128xf32>
    tpu.vector_store %arg4[%c0_24, %c4_25, %c0_26, %c0_27], %47 {strides = array<i32>} : memref<1x13x8x128xf32, #tpu.memory_space<vmem>>, vector<1x1x8x128xf32>,
    %c0_28 = arith.constant 0 : index
    %c8 = arith.constant 8 : index
    %c0_29 = arith.constant 0 : index
    %c0_30 = arith.constant 0 : index
    %48 = vector.load %arg4[%c0_28, %c8, %c0_29, %c0_30] : memref<1x13x8x128xf32, #tpu.memory_space<vmem>>, vector<1x1x8x128xf32>
    %49 = vector.shape_cast %48 : vector<1x1x8x128xf32> to vector<8x128xf32>
    %50 = vector.shape_cast %26 : vector<32x128xf32> to vector<4x8x128xf32>
    %cst_31 = arith.constant dense<0.000000e+00> : vector<8x128xf32>
    %51 = vector.multi_reduction <add>, %50, %cst_31 [0] : vector<4x8x128xf32> to vector<8x128xf32>
    %52 = arith.addf %49, %51 : vector<8x128xf32>
    %c0_32 = arith.constant 0 : index
    %c8_33 = arith.constant 8 : index
    %c0_34 = arith.constant 0 : index
    %c0_35 = arith.constant 0 : index
    %53 = vector.load %arg4[%c0_32, %c8_33, %c0_34, %c0_35] : memref<1x13x8x128xf32, #tpu.memory_space<vmem>>, vector<1x1x8x128xf32>
    %54 = vector.shape_cast %53 : vector<1x1x8x128xf32> to vector<8x128xf32>
    %55 = vector.shape_cast %52 : vector<8x128xf32> to vector<1x1x8x128xf32>
    tpu.vector_store %arg4[%c0_32, %c8_33, %c0_34, %c0_35], %55 {strides = array<i32>} : memref<1x13x8x128xf32, #tpu.memory_space<vmem>>, vector<1x1x8x128xf32>,
    %c1_i32 = arith.constant 1 : i32
    %56 = vector.broadcast %c1_i32 : i32 to vector<32x128xi32>
    %57 = arith.cmpi eq, %7, %56 : vector<32x128xi32>
    %58 = arith.extui %57 : vector<32x128xi1> to vector<32x128xi32>
    %59 = arith.sitofp %58 : vector<32x128xi32> to vector<32x128xf32>
    %60 = vector.extract_strided_slice %12 {offsets = [1, 0, 0], sizes = [1, 32, 128], strides = [1, 1, 1]} : vector<4x32x128xf32> to vector<1x32x128xf32>
    %61 = vector.shape_cast %60 : vector<1x32x128xf32> to vector<32x128xf32>
    %62 = arith.mulf %61, %18 : vector<32x128xf32>
    %63 = arith.mulf %62, %59 : vector<32x128xf32>
    %64 = arith.addf %30, %63 : vector<32x128xf32>
    %c0_36 = arith.constant 0 : index
    %c1 = arith.constant 1 : index
    %c0_37 = arith.constant 0 : index
    %c0_38 = arith.constant 0 : index
    %65 = vector.load %arg4[%c0_36, %c1, %c0_37, %c0_38] : memref<1x13x8x128xf32, #tpu.memory_space<vmem>>, vector<1x1x8x128xf32>
    %66 = vector.shape_cast %65 : vector<1x1x8x128xf32> to vector<8x128xf32>
    %67 = vector.shape_cast %63 : vector<32x128xf32> to vector<4x8x128xf32>
    %cst_39 = arith.constant dense<0.000000e+00> : vector<8x128xf32>
    %68 = vector.multi_reduction <add>, %67, %cst_39 [0] : vector<4x8x128xf32> to vector<8x128xf32>
    %69 = arith.addf %66, %68 : vector<8x128xf32>
    %c0_40 = arith.constant 0 : index
    %c1_41 = arith.constant 1 : index
    %c0_42 = arith.constant 0 : index
    %c0_43 = arith.constant 0 : index
    %70 = vector.load %arg4[%c0_40, %c1_41, %c0_42, %c0_43] : memref<1x13x8x128xf32, #tpu.memory_space<vmem>>, vector<1x1x8x128xf32>
    %71 = vector.shape_cast %70 : vector<1x1x8x128xf32> to vector<8x128xf32>
    %72 = vector.shape_cast %69 : vector<8x128xf32> to vector<1x1x8x128xf32>
    tpu.vector_store %arg4[%c0_40, %c1_41, %c0_42, %c0_43], %72 {strides = array<i32>} : memref<1x13x8x128xf32, #tpu.memory_space<vmem>>, vector<1x1x8x128xf32>,
    %c0_44 = arith.constant 0 : index
    %c5 = arith.constant 5 : index
    %c0_45 = arith.constant 0 : index
    %c0_46 = arith.constant 0 : index
    %73 = vector.load %arg4[%c0_44, %c5, %c0_45, %c0_46] : memref<1x13x8x128xf32, #tpu.memory_space<vmem>>, vector<1x1x8x128xf32>
    %74 = vector.shape_cast %73 : vector<1x1x8x128xf32> to vector<8x128xf32>
    %75 = arith.mulf %62, %22 : vector<32x128xf32>
    %76 = vector.shape_cast %75 : vector<32x128xf32> to vector<4x8x128xf32>
    %cst_47 = arith.constant dense<0.000000e+00> : vector<8x128xf32>
    %77 = vector.multi_reduction <add>, %76, %cst_47 [0] : vector<4x8x128xf32> to vector<8x128xf32>
    %78 = arith.addf %74, %77 : vector<8x128xf32>
    %c0_48 = arith.constant 0 : index
    %c5_49 = arith.constant 5 : index
    %c0_50 = arith.constant 0 : index
    %c0_51 = arith.constant 0 : index
    %79 = vector.load %arg4[%c0_48, %c5_49, %c0_50, %c0_51] : memref<1x13x8x128xf32, #tpu.memory_space<vmem>>, vector<1x1x8x128xf32>
    %80 = vector.shape_cast %79 : vector<1x1x8x128xf32> to vector<8x128xf32>
    %81 = vector.shape_cast %78 : vector<8x128xf32> to vector<1x1x8x128xf32>
    tpu.vector_store %arg4[%c0_48, %c5_49, %c0_50, %c0_51], %81 {strides = array<i32>} : memref<1x13x8x128xf32, #tpu.memory_space<vmem>>, vector<1x1x8x128xf32>,
    %c0_52 = arith.constant 0 : index
    %c9 = arith.constant 9 : index
    %c0_53 = arith.constant 0 : index
    %c0_54 = arith.constant 0 : index
    %82 = vector.load %arg4[%c0_52, %c9, %c0_53, %c0_54] : memref<1x13x8x128xf32, #tpu.memory_space<vmem>>, vector<1x1x8x128xf32>
    %83 = vector.shape_cast %82 : vector<1x1x8x128xf32> to vector<8x128xf32>
    %84 = vector.shape_cast %59 : vector<32x128xf32> to vector<4x8x128xf32>
    %cst_55 = arith.constant dense<0.000000e+00> : vector<8x128xf32>
    %85 = vector.multi_reduction <add>, %84, %cst_55 [0] : vector<4x8x128xf32> to vector<8x128xf32>
    %86 = arith.addf %83, %85 : vector<8x128xf32>
    %c0_56 = arith.constant 0 : index
    %c9_57 = arith.constant 9 : index
    %c0_58 = arith.constant 0 : index
    %c0_59 = arith.constant 0 : index
    %87 = vector.load %arg4[%c0_56, %c9_57, %c0_58, %c0_59] : memref<1x13x8x128xf32, #tpu.memory_space<vmem>>, vector<1x1x8x128xf32>
    %88 = vector.shape_cast %87 : vector<1x1x8x128xf32> to vector<8x128xf32>
    %89 = vector.shape_cast %86 : vector<8x128xf32> to vector<1x1x8x128xf32>
    tpu.vector_store %arg4[%c0_56, %c9_57, %c0_58, %c0_59], %89 {strides = array<i32>} : memref<1x13x8x128xf32, #tpu.memory_space<vmem>>, vector<1x1x8x128xf32>,
    %c2_i32 = arith.constant 2 : i32
    %90 = vector.broadcast %c2_i32 : i32 to vector<32x128xi32>
    %91 = arith.cmpi eq, %7, %90 : vector<32x128xi32>
    %92 = arith.extui %91 : vector<32x128xi1> to vector<32x128xi32>
    %93 = arith.sitofp %92 : vector<32x128xi32> to vector<32x128xf32>
    %94 = vector.extract_strided_slice %12 {offsets = [2, 0, 0], sizes = [1, 32, 128], strides = [1, 1, 1]} : vector<4x32x128xf32> to vector<1x32x128xf32>
    %95 = vector.shape_cast %94 : vector<1x32x128xf32> to vector<32x128xf32>
    %96 = arith.mulf %95, %18 : vector<32x128xf32>
    %97 = arith.mulf %96, %93 : vector<32x128xf32>
    %98 = arith.addf %64, %97 : vector<32x128xf32>
    %c0_60 = arith.constant 0 : index
    %c2 = arith.constant 2 : index
    %c0_61 = arith.constant 0 : index
    %c0_62 = arith.constant 0 : index
    %99 = vector.load %arg4[%c0_60, %c2, %c0_61, %c0_62] : memref<1x13x8x128xf32, #tpu.memory_space<vmem>>, vector<1x1x8x128xf32>
    %100 = vector.shape_cast %99 : vector<1x1x8x128xf32> to vector<8x128xf32>
    %101 = vector.shape_cast %97 : vector<32x128xf32> to vector<4x8x128xf32>
    %cst_63 = arith.constant dense<0.000000e+00> : vector<8x128xf32>
    %102 = vector.multi_reduction <add>, %101, %cst_63 [0] : vector<4x8x128xf32> to vector<8x128xf32>
    %103 = arith.addf %100, %102 : vector<8x128xf32>
    %c0_64 = arith.constant 0 : index
    %c2_65 = arith.constant 2 : index
    %c0_66 = arith.constant 0 : index
    %c0_67 = arith.constant 0 : index
    %104 = vector.load %arg4[%c0_64, %c2_65, %c0_66, %c0_67] : memref<1x13x8x128xf32, #tpu.memory_space<vmem>>, vector<1x1x8x128xf32>
    %105 = vector.shape_cast %104 : vector<1x1x8x128xf32> to vector<8x128xf32>
    %106 = vector.shape_cast %103 : vector<8x128xf32> to vector<1x1x8x128xf32>
    tpu.vector_store %arg4[%c0_64, %c2_65, %c0_66, %c0_67], %106 {strides = array<i32>} : memref<1x13x8x128xf32, #tpu.memory_space<vmem>>, vector<1x1x8x128xf32>,
    %c0_68 = arith.constant 0 : index
    %c6 = arith.constant 6 : index
    %c0_69 = arith.constant 0 : index
    %c0_70 = arith.constant 0 : index
    %107 = vector.load %arg4[%c0_68, %c6, %c0_69, %c0_70] : memref<1x13x8x128xf32, #tpu.memory_space<vmem>>, vector<1x1x8x128xf32>
    %108 = vector.shape_cast %107 : vector<1x1x8x128xf32> to vector<8x128xf32>
    %109 = arith.mulf %96, %22 : vector<32x128xf32>
    %110 = vector.shape_cast %109 : vector<32x128xf32> to vector<4x8x128xf32>
    %cst_71 = arith.constant dense<0.000000e+00> : vector<8x128xf32>
    %111 = vector.multi_reduction <add>, %110, %cst_71 [0] : vector<4x8x128xf32> to vector<8x128xf32>
    %112 = arith.addf %108, %111 : vector<8x128xf32>
    %c0_72 = arith.constant 0 : index
    %c6_73 = arith.constant 6 : index
    %c0_74 = arith.constant 0 : index
    %c0_75 = arith.constant 0 : index
    %113 = vector.load %arg4[%c0_72, %c6_73, %c0_74, %c0_75] : memref<1x13x8x128xf32, #tpu.memory_space<vmem>>, vector<1x1x8x128xf32>
    %114 = vector.shape_cast %113 : vector<1x1x8x128xf32> to vector<8x128xf32>
    %115 = vector.shape_cast %112 : vector<8x128xf32> to vector<1x1x8x128xf32>
    tpu.vector_store %arg4[%c0_72, %c6_73, %c0_74, %c0_75], %115 {strides = array<i32>} : memref<1x13x8x128xf32, #tpu.memory_space<vmem>>, vector<1x1x8x128xf32>,
    %c0_76 = arith.constant 0 : index
    %c10 = arith.constant 10 : index
    %c0_77 = arith.constant 0 : index
    %c0_78 = arith.constant 0 : index
    %116 = vector.load %arg4[%c0_76, %c10, %c0_77, %c0_78] : memref<1x13x8x128xf32, #tpu.memory_space<vmem>>, vector<1x1x8x128xf32>
    %117 = vector.shape_cast %116 : vector<1x1x8x128xf32> to vector<8x128xf32>
    %118 = vector.shape_cast %93 : vector<32x128xf32> to vector<4x8x128xf32>
    %cst_79 = arith.constant dense<0.000000e+00> : vector<8x128xf32>
    %119 = vector.multi_reduction <add>, %118, %cst_79 [0] : vector<4x8x128xf32> to vector<8x128xf32>
    %120 = arith.addf %117, %119 : vector<8x128xf32>
    %c0_80 = arith.constant 0 : index
    %c10_81 = arith.constant 10 : index
    %c0_82 = arith.constant 0 : index
    %c0_83 = arith.constant 0 : index
    %121 = vector.load %arg4[%c0_80, %c10_81, %c0_82, %c0_83] : memref<1x13x8x128xf32, #tpu.memory_space<vmem>>, vector<1x1x8x128xf32>
    %122 = vector.shape_cast %121 : vector<1x1x8x128xf32> to vector<8x128xf32>
    %123 = vector.shape_cast %120 : vector<8x128xf32> to vector<1x1x8x128xf32>
    tpu.vector_store %arg4[%c0_80, %c10_81, %c0_82, %c0_83], %123 {strides = array<i32>} : memref<1x13x8x128xf32, #tpu.memory_space<vmem>>, vector<1x1x8x128xf32>,
    %c3_i32 = arith.constant 3 : i32
    %124 = vector.broadcast %c3_i32 : i32 to vector<32x128xi32>
    %125 = arith.cmpi eq, %7, %124 : vector<32x128xi32>
    %126 = arith.extui %125 : vector<32x128xi1> to vector<32x128xi32>
    %127 = arith.sitofp %126 : vector<32x128xi32> to vector<32x128xf32>
    %128 = vector.extract_strided_slice %12 {offsets = [3, 0, 0], sizes = [1, 32, 128], strides = [1, 1, 1]} : vector<4x32x128xf32> to vector<1x32x128xf32>
    %129 = vector.shape_cast %128 : vector<1x32x128xf32> to vector<32x128xf32>
    %130 = arith.mulf %129, %18 : vector<32x128xf32>
    %131 = arith.mulf %130, %127 : vector<32x128xf32>
    %132 = arith.addf %98, %131 : vector<32x128xf32>
    %c0_84 = arith.constant 0 : index
    %c3 = arith.constant 3 : index
    %c0_85 = arith.constant 0 : index
    %c0_86 = arith.constant 0 : index
    %133 = vector.load %arg4[%c0_84, %c3, %c0_85, %c0_86] : memref<1x13x8x128xf32, #tpu.memory_space<vmem>>, vector<1x1x8x128xf32>
    %134 = vector.shape_cast %133 : vector<1x1x8x128xf32> to vector<8x128xf32>
    %135 = vector.shape_cast %131 : vector<32x128xf32> to vector<4x8x128xf32>
    %cst_87 = arith.constant dense<0.000000e+00> : vector<8x128xf32>
    %136 = vector.multi_reduction <add>, %135, %cst_87 [0] : vector<4x8x128xf32> to vector<8x128xf32>
    %137 = arith.addf %134, %136 : vector<8x128xf32>
    %c0_88 = arith.constant 0 : index
    %c3_89 = arith.constant 3 : index
    %c0_90 = arith.constant 0 : index
    %c0_91 = arith.constant 0 : index
    %138 = vector.load %arg4[%c0_88, %c3_89, %c0_90, %c0_91] : memref<1x13x8x128xf32, #tpu.memory_space<vmem>>, vector<1x1x8x128xf32>
    %139 = vector.shape_cast %138 : vector<1x1x8x128xf32> to vector<8x128xf32>
    %140 = vector.shape_cast %137 : vector<8x128xf32> to vector<1x1x8x128xf32>
    tpu.vector_store %arg4[%c0_88, %c3_89, %c0_90, %c0_91], %140 {strides = array<i32>} : memref<1x13x8x128xf32, #tpu.memory_space<vmem>>, vector<1x1x8x128xf32>,
    %c0_92 = arith.constant 0 : index
    %c7 = arith.constant 7 : index
    %c0_93 = arith.constant 0 : index
    %c0_94 = arith.constant 0 : index
    %141 = vector.load %arg4[%c0_92, %c7, %c0_93, %c0_94] : memref<1x13x8x128xf32, #tpu.memory_space<vmem>>, vector<1x1x8x128xf32>
    %142 = vector.shape_cast %141 : vector<1x1x8x128xf32> to vector<8x128xf32>
    %143 = arith.mulf %130, %22 : vector<32x128xf32>
    %144 = vector.shape_cast %143 : vector<32x128xf32> to vector<4x8x128xf32>
    %cst_95 = arith.constant dense<0.000000e+00> : vector<8x128xf32>
    %145 = vector.multi_reduction <add>, %144, %cst_95 [0] : vector<4x8x128xf32> to vector<8x128xf32>
    %146 = arith.addf %142, %145 : vector<8x128xf32>
    %c0_96 = arith.constant 0 : index
    %c7_97 = arith.constant 7 : index
    %c0_98 = arith.constant 0 : index
    %c0_99 = arith.constant 0 : index
    %147 = vector.load %arg4[%c0_96, %c7_97, %c0_98, %c0_99] : memref<1x13x8x128xf32, #tpu.memory_space<vmem>>, vector<1x1x8x128xf32>
    %148 = vector.shape_cast %147 : vector<1x1x8x128xf32> to vector<8x128xf32>
    %149 = vector.shape_cast %146 : vector<8x128xf32> to vector<1x1x8x128xf32>
    tpu.vector_store %arg4[%c0_96, %c7_97, %c0_98, %c0_99], %149 {strides = array<i32>} : memref<1x13x8x128xf32, #tpu.memory_space<vmem>>, vector<1x1x8x128xf32>,
    %c0_100 = arith.constant 0 : index
    %c11 = arith.constant 11 : index
    %c0_101 = arith.constant 0 : index
    %c0_102 = arith.constant 0 : index
    %150 = vector.load %arg4[%c0_100, %c11, %c0_101, %c0_102] : memref<1x13x8x128xf32, #tpu.memory_space<vmem>>, vector<1x1x8x128xf32>
    %151 = vector.shape_cast %150 : vector<1x1x8x128xf32> to vector<8x128xf32>
    %152 = vector.shape_cast %127 : vector<32x128xf32> to vector<4x8x128xf32>
    %cst_103 = arith.constant dense<0.000000e+00> : vector<8x128xf32>
    %153 = vector.multi_reduction <add>, %152, %cst_103 [0] : vector<4x8x128xf32> to vector<8x128xf32>
    %154 = arith.addf %151, %153 : vector<8x128xf32>
    %c0_104 = arith.constant 0 : index
    %c11_105 = arith.constant 11 : index
    %c0_106 = arith.constant 0 : index
    %c0_107 = arith.constant 0 : index
    %155 = vector.load %arg4[%c0_104, %c11_105, %c0_106, %c0_107] : memref<1x13x8x128xf32, #tpu.memory_space<vmem>>, vector<1x1x8x128xf32>
    %156 = vector.shape_cast %155 : vector<1x1x8x128xf32> to vector<8x128xf32>
    %157 = vector.shape_cast %154 : vector<8x128xf32> to vector<1x1x8x128xf32>
    tpu.vector_store %arg4[%c0_104, %c11_105, %c0_106, %c0_107], %157 {strides = array<i32>} : memref<1x13x8x128xf32, #tpu.memory_space<vmem>>, vector<1x1x8x128xf32>,
    %cst_108 = arith.constant 1.000000e+00 : f32
    %158 = vector.broadcast %cst_108 : f32 to vector<32x128xf32>
    %159 = arith.subf %158, %132 : vector<32x128xf32>
    %160 = arith.mulf %159, %159 : vector<32x128xf32>
    %cst_109 = arith.constant 0.000000e+00 : f32
    %161 = vector.broadcast %cst_109 : f32 to vector<32x128xf32>
    %162 = arith.subf %161, %160 : vector<32x128xf32>
    %cst_110 = arith.constant 9.99999993E-9 : f32
    %163 = vector.broadcast %cst_110 : f32 to vector<32x128xf32>
    %164 = arith.addf %132, %163 : vector<32x128xf32>
    %165 = math.log %164 : vector<32x128xf32>
    %166 = arith.mulf %162, %165 : vector<32x128xf32>
    %167 = arith.mulf %166, %22 : vector<32x128xf32>
    %c0_111 = arith.constant 0 : index
    %c12 = arith.constant 12 : index
    %c0_112 = arith.constant 0 : index
    %c0_113 = arith.constant 0 : index
    %168 = vector.load %arg4[%c0_111, %c12, %c0_112, %c0_113] : memref<1x13x8x128xf32, #tpu.memory_space<vmem>>, vector<1x1x8x128xf32>
    %169 = vector.shape_cast %168 : vector<1x1x8x128xf32> to vector<8x128xf32>
    %170 = vector.shape_cast %167 : vector<32x128xf32> to vector<4x8x128xf32>
    %cst_114 = arith.constant dense<0.000000e+00> : vector<8x128xf32>
    %171 = vector.multi_reduction <add>, %170, %cst_114 [0] : vector<4x8x128xf32> to vector<8x128xf32>
    %172 = arith.addf %169, %171 : vector<8x128xf32>
    %c0_115 = arith.constant 0 : index
    %c12_116 = arith.constant 12 : index
    %c0_117 = arith.constant 0 : index
    %c0_118 = arith.constant 0 : index
    %173 = vector.load %arg4[%c0_115, %c12_116, %c0_117, %c0_118] : memref<1x13x8x128xf32, #tpu.memory_space<vmem>>, vector<1x1x8x128xf32>
    %174 = vector.shape_cast %173 : vector<1x1x8x128xf32> to vector<8x128xf32>
    %175 = vector.shape_cast %172 : vector<8x128xf32> to vector<1x1x8x128xf32>
    tpu.vector_store %arg4[%c0_115, %c12_116, %c0_117, %c0_118], %175 {strides = array<i32>} : memref<1x13x8x128xf32, #tpu.memory_space<vmem>>, vector<1x1x8x128xf32>,
    return
  }
  func.func @transform_0(%arg0: i32, %arg1: i32) -> (i32, i32, i32, i32) {
    %c0_i32 = arith.constant 0 : i32
    %c0_i32_0 = arith.constant 0 : i32
    %c0_i32_1 = arith.constant 0 : i32
    return %arg0, %c0_i32, %arg1, %c0_i32_0 : i32, i32, i32, i32
  }
  func.func @transform_1(%arg0: i32, %arg1: i32) -> (i32, i32, i32, i32) {
    %c0_i32 = arith.constant 0 : i32
    %c0_i32_0 = arith.constant 0 : i32
    %c0_i32_1 = arith.constant 0 : i32
    return %arg0, %c0_i32, %arg1, %c0_i32_0 : i32, i32, i32, i32
  }
  func.func @transform_2(%arg0: i32, %arg1: i32) -> (i32, i32, i32, i32) {
    %c0_i32 = arith.constant 0 : i32
    %c0_i32_0 = arith.constant 0 : i32
    %c0_i32_1 = arith.constant 0 : i32
    %c0_i32_2 = arith.constant 0 : i32
    return %arg0, %c0_i32, %c0_i32_0, %c0_i32_1 : i32, i32, i32, i32
  }
}

</mosaic_0001>

<bundles_post_ra>
// kernel: tpu_custom_call.1
= control target key start
LH: loop header
LB: loop body
LE: loop exit
PB: predicated region body
PF: predicated region fallthrough
CT: control target
= control target key end

     0   :  { %7 = vsyncpa [#allocation3], 0  ;;  %s1536_s0 = inlined_call_operand.hbm [shape: f32[2,4,32,128], index: 0, kind: input, shape index: {}]   ;;  %s1537_s1 = inlined_call_operand.hbm [shape: s8[2,1,32,128], index: 1, kind: input, shape index: {}]   ;;  %s1538_s2 = inlined_call_operand.hbm [shape: f32[2,13,8,128], index: 2, kind: output, shape index: {}]  }
   0x1   :  { %9 = vsyncpa [#allocation3 + $0x1], 0 }
   0x2   :  { %10 = vsyncpa [#allocation6], 0 }
   0x3   :  { %12 = vsyncpa [#allocation6 + $0x1], 0 }
   0x4   :  { %13 = vsyncpa [#allocation4], 0 }
   0x5   :  { %15 = vsyncpa [#allocation4 + $0x1], 0  ;;  %s1062_s9 = smov 0   ;;  %s1064_s10 = smov 0  }
   0x6   :  { %s1066_s11 = smov 0   ;;  %s1068_s12 = smov 0  }
   0x7   :  { %s1070_s13 = smov 0   ;;  %s1072_s14 = smov 0  }
   0x8 LB: > { %s709_s15 = sadd.s32 4294967295, %s1037_s14   ;;  %s710_s16 = sadd.s32 4294967294, %s1037_s14   ;;  %s1037_s14 = sphi %s1072_s14, %s21_s14   ;;  %s1033_s13 = sphi %s1070_s13, %s1557_s13   ;;  %s1029_s12 = sphi %s1068_s12, %s1556_s12   ;;  %s1025_s11 = sphi %s1066_s11, %s1555_s11   ;;  %s1021_s10 = sphi %s1064_s10, %s1554_s10   ;;  %s1017_s9 = sphi %s1062_s9, %s1553_s9  }
   0x9   : > { %s33_s17 = sadd.s32 1, %s1033_s13  ;;  %s42_s18 = sadd.s32 1, %s1025_s11 }
   0xa   : > { %p35_p0 = scmp.ge.s32.totalorder %s33_s17, 2  ;;  %p49_p1 = scmp.ne.s32.totalorder %s1025_s11, %s1021_s10 }
   0xb   : > { %p50_p2 = scmp.eq.s32.totalorder %s1037_s14, 0  ;;  %p55_p3 = scmp.ne.s32.totalorder %s1021_s10, %s1017_s9 }
   0xc   : > { %s1559_s17 = smov (%p35_p0, %s33_s17), 0  ;;  %p56_p5 = scmp.eq.s32.totalorder %s709_s15, 0 }
   0xd   : > { %p1103_p4 = por %p50_p2, %p49_p1  ;;  %s37_s20 = ssub.s32 %s1033_s13, %s1559_s17 }
   0xe   : > { %p107_p6 = scmp.eq.s32.totalorder %s709_s15, 1  ;;  %p40_p7 = scmp.eq.s32.totalorder %s37_s20, 0 }
   0xf   : > { %p1109_p8 = por %p56_p5, %p55_p3  ;;  %p113_p10 = scmp.eq.s32.totalorder %s710_s16, 1 }
  0x10   : > { %p1113_p9 = por %p107_p6, %p49_p1  ;;  %p788_p13 = scmp.lt.s32.totalorder %s1037_s14, 2 }
  0x11   : > { %s1542_s21 = scalar_select %p1109_p8, 1, 0 }
  0x12   : > { %s1543_s22 = scalar_select %p1113_p9, 1, 0 }
  0x13   : > { %s1118_s23 = scalar_select %p40_p7, %s1025_s11, %s42_s18  }
  0x14   : > { %p1120_p11 = por %p113_p10, %p55_p3  ;;  %s1127_s25 = sand.u32 1, %s1025_s11  }
  0x15   : > { %s713_s26 = sshll.u32 %s1127_s25, 7  ;;  %s768_s27 = sshll.u32 %s1033_s13, 11 }
  0x16   : > { %s1544_s24 = scalar_select %p1120_p11, 1, 0 }
  0x17   : > { %s1134_s30 = scalar_lea.hbm %s1536_s0, %s768_s27  ;;  %s137_s3 = scalar_lea.vmem [#allocation2], %s713_s26 }
  0x18   : > { %s146_s4 = sshll.u32 %s137_s3, 4  ;;  %p1140_p0 = pnand %p788_p13, %p1103_p4  ;;  %s1136_s4 = int_to_ptr.vmem [resolvable:$true] %s146_s4 }
  0x19   : > { %s134_s6 = scalar_lea.sflag [#allocation3], %s1127_s25  ;;  %s891_s7 = scalar_lea.hbm %s1134_s30, 2048 }
  0x1a   : > { %p892_p2 = scmp.ne.s32.totalorder %s1134_s30, %s891_s7  ;;  %p893_p3 = pneg %p1140_p0 }
  0x1b   : > { %s896_s16 = scalar_lea.hbm %s1536_s0, 4096  ;;  %p897_p4 = scmp.lt.u32.totalorder %s1134_s30, %s1536_s0 }
  0x1c   : > { %p894_p5 = pnand %p893_p3, %p892_p2  ;;  %p898_p7 = scmp.lt.u32.totalorder %s896_s16, %s891_s7 }
  0x1d   : > { %p900_p13 = scmp.lt.u32.totalorder %s891_s7, %s1134_s30 }
  0x1e   : > { %p895_p6 = pneg %p894_p5  ;;  %p899_p10 = por %p898_p7, %p897_p4 }
  0x20   : > { %p901_p12 = por %p900_p13, %p899_p10 }
  0x22   : > { %p902_p1 = pnand %p901_p12, %p895_p6 }
  0x24   : > { %905 = shalt.err (!%p902_p1)
}
  0x25   : > { %s906_s20 = scalar_lea.vmem %s1136_s4, 2048  ;;  %s1039_s26 = smov [#allocation2]  }
  0x26   : > { %p907_p2 = scmp.ne.s32.totalorder %s1136_s4, %s906_s20  ;;  %s911_s27 = sshll.u32 %s1039_s26, 4  ;;  %s912_s27 = int_to_ptr.vmem [resolvable:$false] %s911_s27 }
  0x27   : > { %s913_s28 = scalar_lea.vmem %s912_s27, 4096  ;;  %p914_p9 = scmp.lt.s32.totalorder %s1136_s4, %s912_s27 }
  0x28   : > { %p909_p5 = pnand %p907_p2, %p893_p3  ;;  %p915_p4 = scmp.lt.s32.totalorder %s913_s28, %s906_s20 }
  0x2a   : > { %p910_p11 = pneg %p909_p5  ;;  %p916_p7 = por %p915_p4, %p914_p9 }
  0x2c   : > { %p917_p10 = pnand %p916_p7, %p910_p11 }
  0x2e   : > { %920 = shalt.err (!%p917_p10)
}
  0x2f   : > { %s1040_s29 = smov 128   ;;  %s1041_s3 = smov 8  }
  0x30   : > { %780 = dma.hbm_to_vmem [thread:$0]  (!%p1140_p0), %s1134_s30, 2048, %s1136_s4, %s134_s6, %s1040_s29, %s1040_s29, %s1041_s3  }
  0x31   : > { %p173_p12 = scmp.lt.s32.totalorder %s1037_s14, 3  ;;  %s716_s7 = sshll.u32 %s1127_s25, 3 }
  0x32   : > { %s717_s8 = sshll.u32 %s1033_s13, 7  ;;  %p1546_p9 = scmp.ge.s32.totalorder %s1037_s14, 1 }
  0x33   : > { %s1185_s19 = scalar_lea.hbm %s1537_s1, %s717_s8  ;;  %s160_s20 = scalar_lea.vmem [#allocation5], %s716_s7 }
  0x34   : > { %p1178_p11 = pnand %p1546_p9, %p173_p12  ;;  %s168_s26 = sshll.u32 %s160_s20, 4  ;;  %s169_s26 = int_to_ptr.vmem [resolvable:$true] %s168_s26 }
  0x35   : > { %s157_s30 = scalar_lea.sflag [#allocation6], %s1127_s25  ;;  %s921_s4 = scalar_lea.hbm %s1185_s19, 128 }
  0x36   : > { %s1547_s15 = scalar_select %p1178_p11, 1, 0 }
  0x37   : > { %p922_p1 = scmp.ne.s32.totalorder %s1185_s19, %s921_s4  ;;  %s926_s28 = scalar_lea.hbm %s1537_s1, 256 }
  0x38   : > { %p927_p2 = scmp.lt.u32.totalorder %s1185_s19, %s1537_s1  ;;  %p928_p5 = scmp.lt.u32.totalorder %s926_s28, %s921_s4 }
  0x39   : > { %p924_p6 = pnand %p922_p1, %p893_p3  ;;  %p930_p7 = scmp.lt.u32.totalorder %s921_s4, %s1185_s19 }
  0x3a   : > { %p929_p4 = por %p928_p5, %p927_p2 }
  0x3b   : > { %p925_p13 = pneg %p924_p6 }
  0x3c   : > { %p931_p10 = por %p930_p7, %p929_p4 }
  0x3e   : > { %p932_p12 = pnand %p931_p10, %p925_p13 }
  0x40   : > { %935 = shalt.err (!%p932_p12)
}
  0x41   : > { %s936_s25 = scalar_lea.vmem %s169_s26, 128  ;;  %s1042_s7 = smov [#allocation5]  }
  0x42   : > { %p937_p9 = scmp.ne.s32.totalorder %s169_s26, %s936_s25  ;;  %s941_s8 = sshll.u32 %s1042_s7, 4  ;;  %s942_s8 = int_to_ptr.vmem [resolvable:$false] %s941_s8 }
  0x43   : > { %s943_s16 = scalar_lea.vmem %s942_s8, 256  ;;  %p944_p8 = scmp.lt.s32.totalorder %s169_s26, %s942_s8 }
  0x44   : > { %p939_p1 = pnand %p937_p9, %p893_p3  ;;  %p945_p11 = scmp.lt.s32.totalorder %s943_s16, %s936_s25 }
  0x46   : > { %p940_p6 = pneg %p939_p1  ;;  %p946_p2 = por %p945_p11, %p944_p8 }
  0x48   : > { %p947_p5 = pnand %p946_p2, %p940_p6 }
  0x4a   : > { %950 = shalt.err (!%p947_p5)
}
  0x4b   : > { %783 = dma.hbm_to_vmem [thread:$0]  (!%p1140_p0), %s1185_s19, 128, %s169_s26, %s157_s30  }
  0x4c   : > { %p1548_p13 = scmp.ne.s32.totalorder %s1547_s15, 0 }
  0x4d   : > { %s1210_s18 = sand.u32 (!%p1548_p13), 1, %s1021_s10   ;;  %p1549_p3 = scmp.ne.s32.totalorder (!%p1548_p13), %s1542_s21, 0 }
  0x4e   : > { %177 = sbr.rel (%p1548_p13) target bundleno = 205 (0xcd), region = 28  ;;  %s719_s20 = sshll.u32 (!%p1548_p13), %s1210_s18, 7 }
  0x4f   : > { %s180_s4 = scalar_lea.sflag (!%p1548_p13), [#allocation3], %s1210_s18  ;;  %s183_s6 = scalar_lea.vmem (!%p1548_p13), [#allocation2], %s719_s20 }
  0x55   : > { %1004 = dma.done.wait (%p1549_p3), %s180_s4, 2048  }
  0x56   : > { %1006 = vsyncadd (%p1549_p3), %s180_s4, 4294965248  ;;  %s720_s5 = sshll.u32 %s1210_s18, 3  ;;  %s189_s15 = scalar_lea.sflag [#allocation6], %s1210_s18 }
  0x57   : > { %s192_s19 = scalar_lea.vmem [#allocation5], %s720_s5 }
  0x58   : > { %1008 = dma.done.wait (%p1549_p3), %s189_s15, 128  }
  0x59   : > { %1010 = vsyncadd (%p1549_p3), %s189_s15, 4294967168  ;;  %v236_v0 = vld [vmem:[%s183_s6] sm:$0xff]  ;;  %v237_v1 = vld [vmem:[%s183_s6 + $0x8] sm:$0xff]  ;;  %s769_s21 = smul.u32 104, %s1210_s18  ;;  %s588_s25 = scalar_lea.sflag [#allocation4], %s1210_s18 }
  0x5a   : > { %v238_v2 = vld [vmem:[%s183_s6 + $0x10] sm:$0xff]  ;;  %v239_v3 = vld [vmem:[%s183_s6 + $0x18] sm:$0xff]  ;;  %v240_v4 = vld [vmem:[%s183_s6 + $0x20] sm:$0xff]  ;;  %s770_s30 = smul.u32 1664, %s1029_s12  ;;  %p1550_p0 = scmp.ne.s32.totalorder %s1543_s22, 0 }
  0x5b   : > { %v241_v5 = vld [vmem:[%s183_s6 + $0x28] sm:$0xff]  ;;  %v242_v6 = vld [vmem:[%s183_s6 + $0x30] sm:$0xff]  ;;  %v243_v7 = vld [vmem:[%s183_s6 + $0x38] sm:$0xff]  ;;  %v257_v9 = vmax.f32 %v236_v0, %v240_v4  ;;  %s1309_s26 = scalar_lea.vmem [#allocation7], %s769_s21  ;;  %s1044_s12 = smov [#allocation7]  }
  0x5c   : > { %v244_v8 = vld [vmem:[%s183_s6 + $0x40] sm:$0xff]  ;;  %v260_v10 = vmax.f32 %v237_v1, %v241_v5  ;;  %v245_v11 = vld [vmem:[%s183_s6 + $0x48] sm:$0xff]  ;;  %v246_v12 = vld [vmem:[%s183_s6 + $0x50] sm:$0xff]  ;;  %v263_v14 = vmax.f32 %v238_v2, %v242_v6  ;;  %v266_v15 = vmax.f32 %v239_v3, %v243_v7  ;;  %s601_s27 = sshll.u32 %s1309_s26, 4  ;;  %s1484_s3 = scalar_lea.hbm %s1538_s2, %s770_s30  ;;  %s1486_s27 = int_to_ptr.vmem [resolvable:$true] %s601_s27 }
  0x5d   : > { %v247_v13 = vld [vmem:[%s183_s6 + $0x58] sm:$0xff]  ;;  %v248_v16 = vld [vmem:[%s183_s6 + $0x60] sm:$0xff]  ;;  %v249_v17 = vld [vmem:[%s183_s6 + $0x68] sm:$0xff]  ;;  %v258_v19 = vmax.f32 %v257_v9, %v244_v8  ;;  %s951_s7 = scalar_lea.vmem %s1486_s27, 1664  ;;  %s955_s8 = sshll.u32 %s1044_s12, 4  ;;  %s956_s8 = int_to_ptr.vmem [resolvable:$false] %s955_s8 }
  0x5e   : > { %v250_v18 = vld [vmem:[%s183_s6 + $0x70] sm:$0xff]  ;;  %v261_v20 = vmax.f32 %v260_v10, %v245_v11  ;;  %v251_v21 = vld [vmem:[%s183_s6 + $0x78] sm:$0xff]  ;;  %v252_v22 = vld [vmem:[%s192_s19] sm:$0xff]  ;;  %v264_v23 = vmax.f32 %v263_v14, %v246_v12  ;;  %v267_v24 = vmax.f32 %v266_v15, %v247_v13  ;;  %p952_p8 = scmp.ne.s32.totalorder %s1486_s27, %s951_s7  ;;  %s957_s16 = scalar_lea.vmem %s956_s8, 3328 }
  0x5f   : > { %v259_v25 = vmax.f32 %v258_v19, %v248_v16  ;;  %v1224_v29 = vunpack.c.0.s8 %v252_v22  ;;  %v1226_v30 = vunpack.c.1.s8 %v252_v22  ;;  %v1228_v35 = vunpack.c.2.s8 %v252_v22  ;;  %p958_p7 = scmp.lt.s32.totalorder %s1486_s27, %s956_s8  ;;  %p959_p10 = scmp.lt.s32.totalorder %s957_s16, %s951_s7 }
  0x60   : > { %v262_v26 = vmax.f32 %v261_v20, %v249_v17  ;;  %v265_v27 = vmax.f32 %v264_v23, %v250_v18  ;;  %v268_v28 = vmax.f32 %v267_v24, %v251_v21  ;;  %v1230_v36 = vunpack.c.3.s8 %v252_v22  ;;  %p953_p11 = pnand %p952_p8, %p1550_p0 }
  0x61   : > { %v269_v31 = vsub.f32 %v236_v0, %v259_v25  ;;  %v273_v37 = vsub.f32 %v240_v4, %v259_v25  ;;  %vm357_vm0 = vcmp.eq.s32.totalorder %v1224_v29, 0  ;;  %vm358_vm1 = vcmp.eq.s32.totalorder %v1226_v30, 0  ;;  %p960_p12 = por %p959_p10, %p958_p7 }
  0x62   : > { %v270_v32 = vsub.f32 %v237_v1, %v262_v26  ;;  %v271_v33 = vsub.f32 %v238_v2, %v265_v27  ;;  %v272_v34 = vsub.f32 %v239_v3, %v268_v28  ;;  %v274_v38 = vsub.f32 %v241_v5, %v262_v26  ;;  %p954_p4 = pneg %p953_p11 }
  0x63   : > { %v275_v39 = vsub.f32 %v242_v6, %v265_v27  ;;  %v276_v40 = vsub.f32 %v243_v7, %v268_v28  ;;  %v285_v41 = vmul.f32 1.442695, %v269_v31  ;;  %v277_v44 = vsub.f32 %v244_v8, %v259_v25 }
  0x64   : > { %v287_v42 = vmul.f32 1.442695, %v270_v32  ;;  %v289_v43 = vmul.f32 1.442695, %v271_v33  ;;  %v278_v45 = vsub.f32 %v245_v11, %v262_v26  ;;  %v279_v46 = vsub.f32 %v246_v12, %v265_v27  ;;  %p961_p9 = pnand %p960_p12, %p954_p4 }
  0x65   : > { %v291_v47 = vmul.f32 1.442695, %v272_v34  ;;  %v280_v48 = vsub.f32 %v247_v13, %v268_v28  ;;  %v281_v49 = vsub.f32 %v248_v16, %v259_v25  ;;  %843 = vpow2.f32 %v285_v41 }
  0x66   : > { %v293_v50 = vmul.f32 1.442695, %v273_v37  ;;  %v282_v51 = vsub.f32 %v249_v17, %v262_v26  ;;  %v283_v52 = vsub.f32 %v250_v18, %v265_v27  ;;  %845 = vpow2.f32 %v287_v42 }
  0x67   : > { %v295_v53 = vmul.f32 1.442695, %v274_v38  ;;  %v284_v54 = vsub.f32 %v251_v21, %v268_v28  ;;  %847 = vpow2.f32 %v289_v43  ;;  %v297_v55 = vmul.f32 1.442695, %v275_v39 }
  0x68   : > { %vm359_vm2 = vcmp.eq.s32.totalorder %v1228_v35, 0  ;;  %849 = vpow2.f32 %v291_v47  ;;  %v299_v56 = vmul.f32 1.442695, %v276_v40  ;;  %v301_v57 = vmul.f32 1.442695, %v277_v44 }
  0x69   : > { %vm360_vm3 = vcmp.eq.s32.totalorder %v1230_v36, 0  ;;  %851 = vpow2.f32 %v293_v50  ;;  %v303_v58 = vmul.f32 1.442695, %v278_v45  ;;  %v305_v59 = vmul.f32 1.442695, %v279_v46 }
  0x6a   : > { %v307_v60 = vmul.f32 1.442695, %v280_v48  ;;  %853 = vpow2.f32 %v295_v53  ;;  %v309_v61 = vmul.f32 1.442695, %v281_v49  ;;  %v311_v62 = vmul.f32 1.442695, %v282_v51 }
  0x6b   : > { %v313_v63 = vmul.f32 1.442695, %v283_v52  ;;  %855 = vpow2.f32 %v297_v55  ;;  %v315_v0 = vmul.f32 1.442695, %v284_v54  ;;  %v1043_v1 = vmov 0.0  }
  0x6c   : > { %v1239_v2 = vsel %vm357_vm0, 1.0, %v1043_v1  ;;  %v1244_v3 = vsel %vm358_vm1, 1.0, %v1043_v1  ;;  %857 = vpow2.f32 %v299_v56  ;;  %v1249_v4 = vsel %vm359_vm2, 1.0, %v1043_v1 }
  0x6d   : > { %v396_v5 = vadd.f32 %v1244_v3, %v1239_v2  ;;  %vm401_vm4 = vcmp.eq.s32.totalorder %v1224_v29, 1  ;;  %859 = vpow2.f32 %v301_v57  ;;  %vm402_vm5 = vcmp.eq.s32.totalorder %v1226_v30, 1 }
  0x6e   : > { %vm403_vm6 = vcmp.eq.s32.totalorder %v1228_v35, 1  ;;  %vm404_vm7 = vcmp.eq.s32.totalorder %v1230_v36, 1  ;;  %861 = vpow2.f32 %v303_v58  ;;  %v1260_v7 = vsel %vm401_vm4, 1.0, %v1043_v1 }
  0x6f   : > { %v397_v6 = vadd.f32 %v1249_v4, %v396_v5  ;;  %v1263_v8 = vsel %vm402_vm5, 1.0, %v1043_v1  ;;  %v1265_v9 = vpop.eup %843  ;;  %863 = vpow2.f32 %v305_v59  ;;  %v1270_v10 = vsel %vm360_vm3, 1.0, %v1043_v1 }
  0x70   : > { %v1273_v11 = vsel %vm403_vm6, 1.0, %v1043_v1  ;;  %v445_v12 = vadd.f32 %v1263_v8, %v1260_v7  ;;  %v1277_v13 = vpop.eup %845  ;;  %865 = vpow2.f32 %v307_v60  ;;  %vm450_vm8 = vcmp.eq.s32.totalorder %v1224_v29, 2 }
  0x71   : > { %v398_v14 = vadd.f32 %v1270_v10, %v397_v6  ;;  %vm451_vm9 = vcmp.eq.s32.totalorder %v1226_v30, 2  ;;  %v1282_v15 = vpop.eup %847  ;;  %867 = vpow2.f32 %v309_v61  ;;  %v1287_v16 = vsel %vm404_vm7, 1.0, %v1043_v1 }
  0x72   : > { %v446_v17 = vadd.f32 %v1273_v11, %v445_v12  ;;  %v1290_v18 = vpop.eup %849  ;;  %869 = vpow2.f32 %v311_v62  ;;  %vm452_vm10 = vcmp.eq.s32.totalorder %v1228_v35, 2  ;;  %vm453_vm11 = vcmp.eq.s32.totalorder %v1230_v36, 2 }
  0x73   : > { %v1294_v19 = vpop.eup %851  ;;  %871 = vpow2.f32 %v313_v63  ;;  %v1298_v21 = vsel %vm450_vm8, 1.0, %v1043_v1  ;;  %v1301_v22 = vsel %vm451_vm9, 1.0, %v1043_v1  ;;  %732 = vst [vmem:[%s1309_s26 + $0x40] sm:$0xff] %v398_v14  ;;  %vm499_vm12 = vcmp.eq.s32.totalorder %v1224_v29, 3 }
  0x74   : > { %v447_v20 = vadd.f32 %v1287_v16, %v446_v17  ;;  %v1303_v23 = vpop.eup %853  ;;  %873 = vpow2.f32 %v315_v0  ;;  %v317_v24 = vadd.f32 %v1294_v19, %v1265_v9  ;;  %v494_v25 = vadd.f32 %v1301_v22, %v1298_v21 }
  0x75   : > { %v1315_v26 = vpop.eup %855  ;;  %v320_v27 = vadd.f32 %v1303_v23, %v1277_v13  ;;  %v1322_v28 = vsel %vm452_vm10, 1.0, %v1043_v1  ;;  %vm500_vm13 = vcmp.eq.s32.totalorder %v1226_v30, 3  ;;  %vm501_vm14 = vcmp.eq.s32.totalorder %v1228_v35, 3 }
  0x76   : > { %v1325_v31 = vpop.eup %857  ;;  %v323_v32 = vadd.f32 %v1315_v26, %v1282_v15  ;;  %v495_v33 = vadd.f32 %v1322_v28, %v494_v25  ;;  %742 = vst [vmem:[%s1309_s26 + $0x48] sm:$0xff] %v447_v20  ;;  %v1337_v38 = vsel %vm453_vm11, 1.0, %v1043_v1  ;;  %v1340_v39 = vsel %vm499_vm12, 1.0, %v1043_v1 }
  0x77   : > { %v860_v34 = vpop.eup %859  ;;  %v326_v37 = vadd.f32 %v1325_v31, %v1290_v18  ;;  %v1343_v40 = vsel %vm500_vm13, 1.0, %v1043_v1  ;;  %vm502_vm15 = vcmp.eq.s32.totalorder %v1230_v36, 3  ;;  %v1355_v47 = vsel %vm501_vm14, 1.0, %v1043_v1 }
  0x78   : > { %v1345_v41 = vpop.eup %861  ;;  %v318_v42 = vadd.f32 %v860_v34, %v317_v24  ;;  %v496_v43 = vadd.f32 %v1337_v38, %v495_v33  ;;  %v543_v44 = vadd.f32 %v1343_v40, %v1340_v39  ;;  %v1365_v53 = vsel %vm502_vm15, 1.0, %v1043_v1 }
  0x79   : > { %v1351_v45 = vpop.eup %863  ;;  %v321_v46 = vadd.f32 %v1345_v41, %v320_v27  ;;  %vm345_vm0 = vcmp.lt.s32.totalorder %v1224_v29, 4  ;;  %vm346_vm1 = vcmp.lt.s32.totalorder %v1226_v30, 4  ;;  %vm347_vm2 = vcmp.lt.s32.totalorder %v1228_v35, 4 }
  0x7a   : > { %v1357_v48 = vpop.eup %865  ;;  %v324_v49 = vadd.f32 %v1351_v45, %v323_v32  ;;  %v544_v50 = vadd.f32 %v1355_v47, %v543_v44  ;;  %752 = vst [vmem:[%s1309_s26 + $0x50] sm:$0xff] %v496_v43  ;;  %vm348_vm3 = vcmp.lt.s32.totalorder %v1230_v36, 4  ;;  %v1387_v32 = vsel %vm345_vm0, 1.0, %v1043_v1 }
  0x7b   : > { %v1361_v51 = vpop.eup %867  ;;  %v327_v52 = vadd.f32 %v1357_v48, %v326_v37  ;;  %v1392_v29 = vsel %vm346_vm1, 1.0, %v1043_v1  ;;  %v1395_v30 = vsel %vm347_vm2, 1.0, %v1043_v1 }
  0x7c   : > { %v1367_v54 = vpop.eup %869  ;;  %v319_v55 = vadd.f32 %v1361_v51, %v318_v42  ;;  %v545_v56 = vadd.f32 %v1365_v53, %v544_v50  ;;  %v1402_v42 = vsel %vm348_vm3, 1.0, %v1043_v1 }
  0x7d   : > { %v1372_v57 = vpop.eup %871  ;;  %v322_v58 = vadd.f32 %v1367_v54, %v321_v46 }
  0x7e   : > { %v1375_v59 = vpop.eup %873  ;;  %v325_v60 = vadd.f32 %v1372_v57, %v324_v49  ;;  %875 = vrcp.f32 %v319_v55  ;;  %762 = vst [vmem:[%s1309_s26 + $0x58] sm:$0xff] %v545_v56 }
  0x7f   : > { %v328_v61 = vadd.f32 %v1375_v59, %v327_v52  ;;  %877 = vrcp.f32 %v322_v58 }
  0x80   : > { %879 = vrcp.f32 %v325_v60 }
  0x81   : > { %881 = vrcp.f32 %v328_v61 }
  0x88   : > { %v876_v62 = vpop.eup %875 }
  0x89   : > { %v878_v63 = vpop.eup %877  ;;  %v333_v0 = vmul.f32 %v876_v62, %v319_v55 }
  0x8a   : > { %v880_v5 = vpop.eup %879  ;;  %v334_v6 = vmul.f32 %v878_v63, %v322_v58 }
  0x8b   : > { %v882_v12 = vpop.eup %881  ;;  %v335_v14 = vmul.f32 %v880_v5, %v325_v60  ;;  %v337_v17 = vsub.f32 2.0, %v333_v0 }
  0x8c   : > { %v336_v20 = vmul.f32 %v882_v12, %v328_v61  ;;  %v338_v24 = vsub.f32 2.0, %v334_v6 }
  0x8d   : > { %v339_v25 = vsub.f32 2.0, %v335_v14  ;;  %v1384_v27 = vmul.f32 %v876_v62, %v337_v17 }
  0x8e   : > { %v340_v33 = vsub.f32 2.0, %v336_v20  ;;  %v1389_v37 = vmul.f32 %v878_v63, %v338_v24 }
  0x8f   : > { %v1397_v35 = vmul.f32 %v880_v5, %v339_v25  ;;  %v369_v36 = vmul.f32 %v1265_v9, %v1384_v27  ;;  %v413_v43 = vmul.f32 %v1294_v19, %v1384_v27  ;;  %v462_v50 = vmul.f32 %v860_v34, %v1384_v27 }
  0x90   : > { %v1406_v44 = vmul.f32 %v882_v12, %v340_v33  ;;  %v370_v46 = vmul.f32 %v1277_v13, %v1389_v37  ;;  %v414_v49 = vmul.f32 %v1303_v23, %v1389_v37 }
  0x91   : > { %v371_v52 = vmul.f32 %v1282_v15, %v1397_v35  ;;  %v373_v9 = vmul.f32 %v1239_v2, %v369_v36  ;;  %v385_v1 = vmul.f32 %v1387_v32, %v369_v36  ;;  %v415_v19 = vmul.f32 %v1315_v26, %v1397_v35 }
  0x92   : > { %v372_v55 = vmul.f32 %v1290_v18, %v1406_v44  ;;  %v374_v13 = vmul.f32 %v1244_v3, %v370_v46  ;;  %v386_v56 = vmul.f32 %v1392_v29, %v370_v46  ;;  %v416_v23 = vmul.f32 %v1325_v31, %v1406_v44 }
  0x93   : > { %v375_v34 = vmul.f32 %v1249_v4, %v371_v52  ;;  %v387_v15 = vmul.f32 %v1395_v30, %v371_v52  ;;  %v417_v2 = vmul.f32 %v1260_v7, %v413_v43  ;;  %v418_v58 = vmul.f32 %v1263_v8, %v414_v49 }
  0x94   : > { %v378_v60 = vadd.f32 %v374_v13, %v373_v9  ;;  %v388_v26 = vmul.f32 %v1402_v42, %v372_v55  ;;  %v389_v61 = vadd.f32 %v386_v56, %v385_v1  ;;  %v463_v3 = vmul.f32 %v1345_v41, %v1389_v37 }
  0x95   : > { %v376_v18 = vmul.f32 %v1270_v10, %v372_v55  ;;  %v419_v62 = vmul.f32 %v1273_v11, %v415_v19  ;;  %v420_v31 = vmul.f32 %v1287_v16, %v416_v23  ;;  %v421_v4 = vadd.f32 %v417_v2, %v373_v9 }
  0x96   : > { %v379_v63 = vadd.f32 %v378_v60, %v375_v34  ;;  %v390_v0 = vadd.f32 %v389_v61, %v387_v15  ;;  %v427_v5 = vadd.f32 %v418_v58, %v417_v2  ;;  %v434_v7 = vmul.f32 %v1387_v32, %v413_v43 }
  0x97   : > { %v422_v8 = vadd.f32 %v418_v58, %v374_v13  ;;  %v423_v6 = vadd.f32 %v419_v62, %v375_v34  ;;  %v435_v12 = vmul.f32 %v1392_v29, %v414_v49  ;;  %v436_v14 = vmul.f32 %v1395_v30, %v415_v19 }
  0x98   : > { %v380_v41 = vadd.f32 %v379_v63, %v376_v18  ;;  %v391_v10 = vadd.f32 %v390_v0, %v388_v26  ;;  %v428_v17 = vadd.f32 %v427_v5, %v419_v62  ;;  %v437_v11 = vmul.f32 %v1402_v42, %v416_v23 }
  0x99   : > { %v438_v16 = vadd.f32 %v435_v12, %v434_v7  ;;  %v464_v20 = vmul.f32 %v1351_v45, %v1397_v35  ;;  %v465_v24 = vmul.f32 %v1357_v48, %v1406_v44  ;;  %v466_v25 = vmul.f32 %v1298_v21, %v462_v50 }
  0x9a   : > { %v429_v33 = vadd.f32 %v428_v17, %v420_v31  ;;  %v467_v36 = vmul.f32 %v1301_v22, %v463_v3  ;;  %v424_v43 = vadd.f32 %v420_v31, %v376_v18  ;;  %382 = vst [vmem:[%s1309_s26] sm:$0xff] %v380_v41  ;;  %730 = vst [vmem:[%s1309_s26 + $0x20] sm:$0xff] %v391_v10 }
  0x9b   : > { %v439_v46 = vadd.f32 %v438_v16, %v436_v14  ;;  %v468_v49 = vmul.f32 %v1322_v28, %v464_v20  ;;  %v469_v52 = vmul.f32 %v1337_v38, %v465_v24  ;;  %v470_v9 = vadd.f32 %v466_v25, %v421_v4 }
  0x9c   : > { %v476_v1 = vadd.f32 %v467_v36, %v466_v25  ;;  %v483_v45 = vmul.f32 %v1387_v32, %v462_v50  ;;  %v471_v48 = vadd.f32 %v467_v36, %v422_v8  ;;  %v484_v55 = vmul.f32 %v1392_v29, %v463_v3  ;;  %738 = vst [vmem:[%s1309_s26 + $0x8] sm:$0xff] %v429_v33 }
  0x9d   : > { %v440_v19 = vadd.f32 %v439_v46, %v437_v11  ;;  %v472_v21 = vadd.f32 %v468_v49, %v423_v6  ;;  %v485_v13 = vmul.f32 %v1395_v30, %v464_v20  ;;  %v486_v28 = vmul.f32 %v1402_v42, %v465_v24 }
  0x9e   : > { %v477_v22 = vadd.f32 %v476_v1, %v468_v49  ;;  %v511_v38 = vmul.f32 %v1361_v51, %v1384_v27  ;;  %v487_v56 = vadd.f32 %v484_v55, %v483_v45  ;;  %v512_v23 = vmul.f32 %v1367_v54, %v1389_v37 }
  0x9f   : > { %v513_v50 = vmul.f32 %v1372_v57, %v1397_v35  ;;  %v473_v34 = vadd.f32 %v469_v52, %v424_v43  ;;  %v514_v2 = vmul.f32 %v1375_v59, %v1406_v44  ;;  %740 = vst [vmem:[%s1309_s26 + $0x28] sm:$0xff] %v440_v19 }
  0xa0   : > { %v478_v15 = vadd.f32 %v477_v22, %v469_v52  ;;  %v515_v58 = vmul.f32 %v1340_v39, %v511_v38  ;;  %v488_v60 = vadd.f32 %v487_v56, %v485_v13  ;;  %v516_v26 = vmul.f32 %v1343_v40, %v512_v23 }
  0xa1   : > { %v517_v51 = vmul.f32 %v1355_v47, %v513_v50  ;;  %v532_v27 = vmul.f32 %v1387_v32, %v511_v38  ;;  %v518_v54 = vmul.f32 %v1365_v53, %v514_v2  ;;  %v533_v37 = vmul.f32 %v1392_v29, %v512_v23 }
  0xa2   : > { %v519_v57 = vadd.f32 %v515_v58, %v470_v9  ;;  %v489_v35 = vadd.f32 %v488_v60, %v486_v28  ;;  %v520_v61 = vadd.f32 %v516_v26, %v471_v48  ;;  %v525_v59 = vadd.f32 %v516_v26, %v515_v58  ;;  %748 = vst [vmem:[%s1309_s26 + $0x10] sm:$0xff] %v478_v15 }
  0xa3   : > { %v521_v3 = vadd.f32 %v517_v51, %v472_v21  ;;  %v522_v39 = vadd.f32 %v518_v54, %v473_v34  ;;  %v534_v40 = vmul.f32 %v1395_v30, %v513_v50  ;;  %v535_v63 = vmul.f32 %v1402_v42, %v514_v2 }
  0xa4   : > { %v560_v44 = vadd.f32 1e-08, %v519_v57  ;;  %v526_v18 = vadd.f32 %v525_v59, %v517_v51  ;;  %v548_v47 = vsub.f32 1.0, %v519_v57  ;;  %v561_v62 = vadd.f32 1e-08, %v520_v61  ;;  %750 = vst [vmem:[%s1309_s26 + $0x30] sm:$0xff] %v489_v35 }
  0xa5   : > { %v562_v31 = vadd.f32 1e-08, %v521_v3  ;;  %v563_v4 = vadd.f32 1e-08, %v522_v39  ;;  %v536_v0 = vadd.f32 %v533_v37, %v532_v27  ;;  %v549_v5 = vsub.f32 1.0, %v520_v61 }
  0xa6   : > { %883 = vlog2.f32 %v560_v44  ;;  %v527_v53 = vadd.f32 %v526_v18, %v518_v54  ;;  %v550_v8 = vsub.f32 1.0, %v521_v3  ;;  %v551_v6 = vsub.f32 1.0, %v522_v39 }
  0xa7   : > { %885 = vlog2.f32 %v561_v62  ;;  %v537_v7 = vadd.f32 %v536_v0, %v534_v40  ;;  %v552_v14 = vmul.f32 %v548_v47, %v548_v47  ;;  %v553_v41 = vmul.f32 %v549_v5, %v549_v5 }
  0xa8   : > { %887 = vlog2.f32 %v562_v31  ;;  %758 = vst [vmem:[%s1309_s26 + $0x18] sm:$0xff] %v527_v53  ;;  %v554_v10 = vmul.f32 %v550_v8, %v550_v8  ;;  %v555_v17 = vmul.f32 %v551_v6, %v551_v6 }
  0xa9   : > { %889 = vlog2.f32 %v563_v4  ;;  %v538_v12 = vadd.f32 %v537_v7, %v535_v63  ;;  %v556_v11 = vsub.f32 0.0, %v552_v14  ;;  %v557_v20 = vsub.f32 0.0, %v553_v41 }
  0xaa   : > { %v558_v33 = vsub.f32 0.0, %v554_v10  ;;  %v559_v43 = vsub.f32 0.0, %v555_v17 }
  0xab   : > { %760 = vst [vmem:[%s1309_s26 + $0x38] sm:$0xff] %v538_v12 }
  0xb0   : > { %v884_v16 = vpop.eup %883 }
  0xb1   : > { %v565_v24 = vmul.f32 0.6931472, %v884_v16  ;;  %v886_v25 = vpop.eup %885 }
  0xb2   : > { %v888_v36 = vpop.eup %887  ;;  %v567_v46 = vmul.f32 0.6931472, %v886_v25 }
  0xb3   : > { %v572_v49 = vmul.f32 %v565_v24, %v556_v11  ;;  %v890_v52 = vpop.eup %889  ;;  %v569_v9 = vmul.f32 0.6931472, %v888_v36 }
  0xb4   : > { %v571_v1 = vmul.f32 0.6931472, %v890_v52  ;;  %v573_v45 = vmul.f32 %v567_v46, %v557_v20 }
  0xb5   : > { %v576_v19 = vmul.f32 %v1387_v32, %v572_v49  ;;  %v574_v48 = vmul.f32 %v569_v9, %v558_v33 }
  0xb6   : > { %v575_v21 = vmul.f32 %v571_v1, %v559_v43  ;;  %v577_v55 = vmul.f32 %v1392_v29, %v573_v45 }
  0xb7   : > { %v578_v22 = vmul.f32 %v1395_v30, %v574_v48 }
  0xb8   : > { %v579_v13 = vmul.f32 %v1402_v42, %v575_v21  ;;  %v582_v28 = vadd.f32 %v577_v55, %v576_v19 }
  0xba   : > { %v583_v38 = vadd.f32 %v582_v28, %v578_v22 }
  0xbc   : > { %v584_v56 = vadd.f32 %v583_v38, %v579_v13 }
  0xbe   : > { %764 = vst [vmem:[%s1309_s26 + $0x60] sm:$0xff] %v584_v56 }
  0xbf   : > { %964 = shalt.err (!%p961_p9)
}
  0xc0   : > { %s965_s20 = scalar_lea.hbm %s1484_s3, 1664  ;;  %s969_s5 = scalar_lea.hbm %s1538_s2, 3328 }
  0xc1   : > { %p966_p1 = scmp.ne.s32.totalorder %s1484_s3, %s965_s20  ;;  %p970_p5 = scmp.lt.u32.totalorder %s1484_s3, %s1538_s2 }
  0xc2   : > { %p971_p13 = scmp.lt.u32.totalorder %s969_s5, %s965_s20  ;;  %p973_p8 = scmp.lt.u32.totalorder %s965_s20, %s1484_s3 }
  0xc3   : > { %p967_p6 = pnand %p966_p1, %p1550_p0 }
  0xc4   : > { %p972_p3 = por %p971_p13, %p970_p5 }
  0xc5   : > { %p968_p2 = pneg %p967_p6 }
  0xc6   : > { %p974_p11 = por %p973_p8, %p972_p3 }
  0xc8   : > { %p975_p4 = pnand %p974_p11, %p968_p2 }
  0xca   : > { %978 = shalt.err (!%p975_p4)
}
  0xcb   : > { %s1045_s21 = smov 128   ;;  %s1046_s26 = smov 8  }
  0xcc   : > { %775 = dma.vmem_to_hbm [thread:$0]  (%p1550_p0), %s1486_s27, 1664, %s1484_s3, %s588_s25, %s1045_s21, %s1045_s21, %s1046_s26  }
  0xcd PF: > { %s616_s30 = sand.u32 1, %s1017_s9   ;;  %p1551_p7 = scmp.ne.s32.totalorder %s1544_s24, 0 }
  0xce   : > { %p1552_p10 = scmp.ge.s32.totalorder %s1037_s14, 2  ;;  %s617_s28 = scalar_lea.sflag [#allocation4], %s616_s30 }
  0xd0   : > { %p785_p12 = pnand %p1552_p10, %p1551_p7 }
  0xd2   : > { %1012 = dma.done.wait (!%p785_p12), %s617_s28, 1664  }
  0xd3   : > { %1014 = vsyncadd (!%p785_p12), %s617_s28, 4294965632  ;;  %s21_s14 = sadd.s32 1, %s1037_s14   ;;  %s1553_s9 = smov %s1021_s10 }
  0xd4   : > { %p18_p9 = scmp.ge.s32.totalorder %s21_s14, 4   ;;  %s1554_s10 = smov %s1025_s11 }
  0xd5   : > { %s1555_s11 = smov %s1118_s23  ;;  %s1556_s12 = smov %s1033_s13 }
  0xd6   : > { %s1557_s13 = smov %s1559_s17  ;;  %20 = sbr.rel (!%p18_p9) target bundleno = 8 (0x8), region = 102 }
  0xdd   :  { %622 = vsyncpa [#allocation3], 1 }
  0xde   :  { %624 = vsyncpa [#allocation3 + $0x1], 1 }
  0xdf   :  { %625 = vsyncpa [#allocation6], 1 }
  0xe0   :  { %627 = vsyncpa [#allocation6 + $0x1], 1 }
  0xe1   :  { %628 = vsyncpa [#allocation4], 1 }
  0xe2   :  { %630 = vsyncpa [#allocation4 + $0x1], 1 }

</bundles_post_ra>
